<compile_context>
chip_gen: v7x
topology: tpu7x:2x2x1
jax: 0.10.0
libtpu: 0.0.40
codegen_flags: <defaults>
</compile_context>

<pallas_src>
import jax
import jax.numpy as jnp
from jax.experimental import pallas as pl
from jax.experimental.pallas import tpu as pltpu

_SUBLANE = 16          # bf16-safe sublane multiple for batch tiles
_LANE = 128


def _round_up(x, m):
    return ((x + m - 1) // m) * m


def _device_kind():
    try:
        return jax.devices()[0].device_kind.lower()
    except Exception:
        return ""


def _is_v5e(kind):
    return ("v5e" in kind) or ("v5 lite" in kind) or ("v5litepod" in kind)


def _has_megacore(kind):
    # chips with >1 TensorCore sharing the grid's "parallel" axes
    return ("v7" in kind) or ("v4" in kind) or ("v5p" in kind)


def _vmem_capacity_bytes(kind):
    try:
        cap = int(getattr(pltpu.get_tpu_info(), "vmem_capacity_bytes"))
        if cap > 0:
            return cap
    except Exception:
        pass
    return (64 << 20) if "v7" in kind else (128 << 20)


def _make_kernel(training, streaming):
    """Kernel body.  x is already in the compute dtype; be/bd are f32."""
    def kernel(x_ref, we_ref, be_ref, wd_ref, bd_ref, *rest):
        rest = list(rest)
        recs_ref = rest.pop(0)
        z_ref = rest.pop(0) if training else None
        acc_ref = rest.pop(0) if streaming else None

        # Encoder: z = ReLU(x @ We + be)   (MXU matmul, f32 accumulation)
        pre = jnp.dot(x_ref[...], we_ref[...], preferred_element_type=jnp.float32)
        z = jnp.maximum(pre + be_ref[...], 0.0)
        if z_ref is not None:                      # training only
            z_ref[...] = z.astype(z_ref.dtype)

        # Decoder: recs = z @ Wd + bd
        dec = jnp.dot(z.astype(wd_ref.dtype), wd_ref[...],
                      preferred_element_type=jnp.float32)

        if not streaming:
            # Single hidden tile: write recs directly (no accumulator round-trip).
            recs_ref[...] = (dec + bd_ref[...]).astype(recs_ref.dtype)
        else:
            h = pl.program_id(1)

            @pl.when(h == 0)
            def _init():
                acc_ref[...] = jnp.zeros_like(acc_ref)

            acc_ref[...] += dec

            @pl.when(h == pl.num_programs(1) - 1)
            def _finalize():
                recs_ref[...] = (acc_ref[...] + bd_ref[...]).astype(recs_ref.dtype)

    return kernel


def sae_forward(x, We, be, Wd, bd, *, training=False, tile_b=None, tile_h=None,
                use_bf16=True, vmem_limit_bytes=None):
    B, d_in = x.shape
    d_hidden = We.shape[1]
    assert We.shape[0] == d_in and Wd.shape == (d_hidden, d_in)

    out_dtype = x.dtype
    out_isz = jnp.dtype(out_dtype).itemsize

    compute_dtype = jnp.bfloat16 if use_bf16 else We.dtype
    cs = jnp.dtype(compute_dtype).itemsize

    kind = _device_kind()
    vmem_cap = _vmem_capacity_bytes(kind)
    vmem_budget = int(vmem_cap * 0.75)        # leave headroom for compiler scratch

    be_p = jnp.asarray(be).reshape(1, d_hidden).astype(jnp.float32)
    bd_p = jnp.asarray(bd).reshape(1, d_in).astype(jnp.float32)
    We_c = We.astype(compute_dtype)
    Wd_c = Wd.astype(compute_dtype)

    # ---- batch tile (MXU M-dim) -------------------------------------------
    user_tb = tile_b is not None
    if tile_b is None:
        tile_b = 128 if _is_v5e(kind) else 256
    tile_b = max(_SUBLANE, _round_up(int(tile_b), _SUBLANE))
    b_ceil = _round_up(B, _SUBLANE)
    tile_b = min(tile_b, b_ceil)
    if (not user_tb) and _has_megacore(kind) and b_ceil >= 2 * _SUBLANE \
            and tile_b * 2 > b_ceil:
        # Keep >=2 batch blocks so the "parallel" axis can span both TensorCores.
        tile_b = _round_up((B + 1) // 2, _SUBLANE)

    # ---- per-step VMEM footprint model (all resident buffers, not just weights)
    def footprint(tb, th, streaming):
        wbuf = 2 if streaming else 1            # streamed weight tiles are 2x buffered
        f = 2 * tb * d_in * cs                  # x tile (double-buffered, compute dtype)
        f += wbuf * d_in * th * cs              # We
        f += wbuf * 8 * th * 4                  # be (f32, sublane-padded)
        f += wbuf * th * d_in * cs              # Wd
        f += 8 * d_in * 4                       # bd (invariant, single-buffered)
        f += 2 * tb * d_in * out_isz            # recs output tile
        if training:
            f += 2 * tb * th * out_isz          # z output tile
        if streaming:
            f += tb * d_in * 4                  # f32 decoder accumulator scratch
        f += 2 * tb * th * 4                    # f32 pre-activation / z intermediates
        return f

    # ---- hidden tile: resident if the whole footprint fits, else stream ----
    if tile_h is not None:
        tile_h = int(tile_h)
        if tile_h >= d_hidden:
            tile_h = d_hidden
        else:
            tile_h = max(_LANE, (tile_h // _LANE) * _LANE)   # lane-aligned
    else:
        if footprint(tile_b, d_hidden, streaming=False) <= vmem_budget:
            tile_h = d_hidden
        else:
            tile_h = _LANE
            for cand in (4096, 3072, 2048, 1536, 1024, 768, 512, 384, 256, 128):
                if cand < d_hidden and footprint(tile_b, cand, True) <= vmem_budget:
                    tile_h = cand
                    break

    if tile_h >= d_hidden:
        tile_h = d_hidden
        H_pad = d_hidden
    else:
        H_pad = _round_up(d_hidden, tile_h)
    nh = H_pad // tile_h
    streaming = nh > 1

    # In streaming mode, amortize weight re-streaming over bigger batch tiles.
    if streaming and not user_tb:
        while tile_b * 2 <= b_ceil and tile_b * 2 <= 1024 \
                and footprint(tile_b * 2, tile_h, True) <= vmem_budget:
            if _has_megacore(kind) and (tile_b * 2) * 2 > b_ceil:
                break
            tile_b *= 2

    B_pad = _round_up(B, tile_b)
    nb = B_pad // tile_b

    # ---- padding (exact: ReLU(0 + 0) = 0 contributes nothing to the decoder)
    x_p = x.astype(compute_dtype)               # pre-cast: half the x DMA bytes
    if B_pad != B:
        x_p = jnp.pad(x_p, ((0, B_pad - B), (0, 0)))
    if H_pad != d_hidden:
        We_c = jnp.pad(We_c, ((0, 0), (0, H_pad - d_hidden)))
        be_p = jnp.pad(be_p, ((0, 0), (0, H_pad - d_hidden)))
        Wd_c = jnp.pad(Wd_c, ((0, H_pad - d_hidden), (0, 0)))

    if vmem_limit_bytes is None:
        need = footprint(tile_b, tile_h, streaming)
        vmem_limit_bytes = min(vmem_cap - (4 << 20),
                               max(vmem_budget, need + (8 << 20)))
    vmem_limit_bytes = int(vmem_limit_bytes)

    # ---- specs -------------------------------------------------------------
    def make_in_specs(single_buffer_invariant):
        def inv(shape, imap):
            if single_buffer_invariant:
                # Grid-invariant block: double-buffering it is pure VMEM waste.
                return pl.BlockSpec(shape, imap, pipeline_mode=pl.Buffered(1))
            return pl.BlockSpec(shape, imap)

        if streaming:
            return [
                pl.BlockSpec((tile_b, d_in), lambda i, h: (i, 0)),    # x
                pl.BlockSpec((d_in, tile_h), lambda i, h: (0, h)),    # We
                pl.BlockSpec((1, tile_h),    lambda i, h: (0, h)),    # be
                pl.BlockSpec((tile_h, d_in), lambda i, h: (h, 0)),    # Wd
                inv((1, d_in),               lambda i, h: (0, 0)),    # bd
            ]
        return [
            pl.BlockSpec((tile_b, d_in), lambda i: (i, 0)),           # x
            inv((d_in, tile_h),          lambda i: (0, 0)),           # We (resident)
            inv((1, tile_h),             lambda i: (0, 0)),           # be
            inv((tile_h, d_in),          lambda i: (0, 0)),           # Wd
            inv((1, d_in),               lambda i: (0, 0)),           # bd
        ]

    if streaming:
        grid = (nb, nh)
        sems = ("parallel", "arbitrary")
        recs_spec = pl.BlockSpec((tile_b, d_in), lambda i, h: (i, 0))
        z_spec = pl.BlockSpec((tile_b, tile_h), lambda i, h: (i, h))
        scratch = [pltpu.VMEM((tile_b, d_in), jnp.float32)]   # f32 decoder accumulator
    else:
        grid = (nb,)
        sems = ("parallel",)
        recs_spec = pl.BlockSpec((tile_b, d_in), lambda i: (i, 0))
        z_spec = pl.BlockSpec((tile_b, tile_h), lambda i: (i, 0))
        scratch = []                                          # no accumulator needed

    kernel = _make_kernel(training, streaming)
    if training:
        out_shape = (jax.ShapeDtypeStruct((B_pad, d_in), out_dtype),
                     jax.ShapeDtypeStruct((B_pad, H_pad), out_dtype))
        out_specs = (recs_spec, z_spec)
    else:
        out_shape = jax.ShapeDtypeStruct((B_pad, d_in), out_dtype)
        out_specs = recs_spec

    flops = 4 * B_pad * d_in * H_pad                          # two matmuls, 2 flops/MAC
    weight_reads = nb if streaming else 1
    bytes_accessed = int(
        x_p.size * x_p.dtype.itemsize
        + weight_reads * (We_c.size + Wd_c.size) * cs
        + (be_p.size + bd_p.size) * 4
        + B_pad * d_in * out_isz
        + (B_pad * H_pad * out_isz if training else 0))
    cost = pl.CostEstimate(flops=int(flops), transcendentals=0,
                           bytes_accessed=bytes_accessed)

    def build(single_buffer_invariant):
        return pl.pallas_call(
            kernel,
            out_shape=out_shape,
            grid_spec=pltpu.PrefetchScalarGridSpec(
                num_scalar_prefetch=0,
                grid=grid,
                in_specs=make_in_specs(single_buffer_invariant),
                out_specs=out_specs,
                scratch_shapes=scratch),
            compiler_params=pltpu.CompilerParams(
                dimension_semantics=sems,
                vmem_limit_bytes=vmem_limit_bytes),
            cost_estimate=cost,
        )

    args = (x_p, We_c, be_p, Wd_c, bd_p)
    try:
        outs = build(True)(*args)
    except Exception:
        # Fallback only toggles single-buffering of invariant blocks; any error
        # from the fallback build propagates to the caller.
        outs = build(False)(*args)

    if training:
        recs, z = outs
        return recs[:B], z[:B, :d_hidden]
    return outs[:B]


def reference_forward(x, We, be, Wd, bd, *, training=False, compute_dtype=None):
    be = jnp.asarray(be).reshape(1, -1).astype(jnp.float32)
    bd = jnp.asarray(bd).reshape(1, -1).astype(jnp.float32)
    if compute_dtype is not None:
        xc, Wec, Wdc = (x.astype(compute_dtype), We.astype(compute_dtype),
                        Wd.astype(compute_dtype))
    else:
        xc, Wec, Wdc = x, We, Wd
    z = jnp.maximum(jnp.dot(xc, Wec, preferred_element_type=jnp.float32) + be, 0.0)
    recs = jnp.dot(z.astype(Wdc.dtype), Wdc, preferred_element_type=jnp.float32) + bd
    recs = recs.astype(x.dtype)
    z = z.astype(x.dtype)
    return (recs, z) if training else recs


if __name__ == "__main__":
    B, d_in, d_hidden = 16, 128, 512
    key = jax.random.PRNGKey(0)
    kx, kwe, kbe, kwd, kbd = jax.random.split(key, 5)

    x = jax.random.normal(kx, (B, d_in), dtype=jnp.float32)
    We = jax.random.normal(kwe, (d_in, d_hidden), dtype=jnp.float32) * 0.05
    be = jax.random.normal(kbe, (1, d_hidden), dtype=jnp.float32) * 0.01
    Wd = jax.random.normal(kwd, (d_hidden, d_in), dtype=jnp.float32) * 0.05
    bd = jax.random.normal(kbd, (1, d_in), dtype=jnp.float32) * 0.01

    # 1) training mode, bf16 MXU path, weights resident (1-D grid, no accumulator)
    recs, z = sae_forward(x, We, be, Wd, bd, training=True, use_bf16=True)
    recs = jax.block_until_ready(recs)
    z = jax.block_until_ready(z)
    recs_ref_bf, z_ref_bf = reference_forward(x, We, be, Wd, bd, training=True,
                                              compute_dtype=jnp.bfloat16)
    assert jnp.allclose(recs, recs_ref_bf, atol=1e-2, rtol=1e-2)
    assert jnp.allclose(z, z_ref_bf, atol=1e-2, rtol=1e-2)

    # 2) training mode, f32 path, hidden-axis streamed (K-reduction + f32 accumulator)
    recs32, z32 = sae_forward(x, We, be, Wd, bd, training=True,
                              use_bf16=False, tile_h=128)
    recs32 = jax.block_until_ready(recs32)
    z32 = jax.block_until_ready(z32)
    recs_ref32, z_ref32 = reference_forward(x, We, be, Wd, bd, training=True)
    assert jnp.allclose(recs32, recs_ref32, atol=2e-4, rtol=2e-4)
    assert jnp.allclose(z32, z_ref32, atol=2e-4, rtol=2e-4)

    # 3) eval mode (no z output written) with a ragged batch exercising padding
    xe = x[:10]
    recs_eval = jax.block_until_ready(
        sae_forward(xe, We, be, Wd, bd, training=False, use_bf16=True))
    recs_eval_ref = reference_forward(xe, We, be, Wd, bd, training=False,
                                      compute_dtype=jnp.bfloat16)
    assert recs_eval.shape == (10, d_in)
    assert jnp.allclose(recs_eval, recs_eval_ref, atol=1e-2, rtol=1e-2)

    print("KERNEL_OK")
</pallas_src>

<mosaic_0001>
module attributes {stable_mosaic.version = 11 : i64} {
  func.func @kernel(%arg0: i32, %arg1: memref<16x128xbf16, #tpu.memory_space<vmem>>, %arg2: memref<128x512xbf16, #tpu.memory_space<vmem>>, %arg3: memref<1x512xf32, #tpu.memory_space<vmem>>, %arg4: memref<512x128xbf16, #tpu.memory_space<vmem>>, %arg5: memref<1x128xf32, #tpu.memory_space<vmem>>, %arg6: memref<16x128xf32, #tpu.memory_space<vmem>>, %arg7: memref<16x512xf32, #tpu.memory_space<vmem>>) attributes {dimension_semantics = [#tpu.dimension_semantics<parallel>], iteration_bounds = array<i64: 1>, scalar_prefetch = 0 : i64, scratch_operands = 0 : i64, tpu.core_type = #tpu.core_type<tc>, window_params = [{transform_indices = @transform_0, window_bounds = array<i64: 16, 128>}, {pipeline_mode = #tpu.pipeline_mode<synchronous>, transform_indices = @transform_1, window_bounds = array<i64: 128, 512>}, {pipeline_mode = #tpu.pipeline_mode<synchronous>, transform_indices = @transform_2, window_bounds = array<i64: 1, 512>}, {pipeline_mode = #tpu.pipeline_mode<synchronous>, transform_indices = @transform_3, window_bounds = array<i64: 512, 128>}, {pipeline_mode = #tpu.pipeline_mode<synchronous>, transform_indices = @transform_4, window_bounds = array<i64: 1, 128>}, {transform_indices = @transform_5, window_bounds = array<i64: 16, 128>}, {transform_indices = @transform_6, window_bounds = array<i64: 16, 512>}]} {
    %c0 = arith.constant 0 : index
    %c0_0 = arith.constant 0 : index
    %0 = vector.load %arg1[%c0, %c0_0] : memref<16x128xbf16, #tpu.memory_space<vmem>>, vector<16x128xbf16>
    %c0_1 = arith.constant 0 : index
    %c0_2 = arith.constant 0 : index
    %1 = vector.load %arg2[%c0_1, %c0_2] : memref<128x512xbf16, #tpu.memory_space<vmem>>, vector<128x512xbf16>
    %cst = arith.constant dense<0.000000e+00> : vector<16x512xf32>
    %2 = tpu.matmul %0, %1, %cst {dimension_numbers = #tpu.dot_dimension_numbers<[1], [0], [0], [1], [0, 0, 1, 1], [], []>} : vector<16x128xbf16>, vector<128x512xbf16>, vector<16x512xf32> -> vector<16x512xf32>
    %c0_3 = arith.constant 0 : index
    %c0_4 = arith.constant 0 : index
    %3 = vector.load %arg3[%c0_3, %c0_4] : memref<1x512xf32, #tpu.memory_space<vmem>>, vector<1x512xf32>
    %4 = vector.broadcast %3 : vector<1x512xf32> to vector<16x512xf32>
    %5 = arith.addf %2, %4 : vector<16x512xf32>
    %cst_5 = arith.constant 0.000000e+00 : f32
    %6 = vector.broadcast %cst_5 : f32 to vector<16x512xf32>
    %7 = arith.maximumf %5, %6 : vector<16x512xf32>
    %c0_6 = arith.constant 0 : index
    %c0_7 = arith.constant 0 : index
    %8 = vector.load %arg7[%c0_6, %c0_7] : memref<16x512xf32, #tpu.memory_space<vmem>>, vector<16x512xf32>
    tpu.vector_store %arg7[%c0_6, %c0_7], %7 {strides = array<i32>} : memref<16x512xf32, #tpu.memory_space<vmem>>, vector<16x512xf32>,
    %9 = arith.truncf %7 : vector<16x512xf32> to vector<16x512xbf16>
    %c0_8 = arith.constant 0 : index
    %c0_9 = arith.constant 0 : index
    %10 = vector.load %arg4[%c0_8, %c0_9] : memref<512x128xbf16, #tpu.memory_space<vmem>>, vector<512x128xbf16>
    %cst_10 = arith.constant dense<0.000000e+00> : vector<16x128xf32>
    %11 = tpu.matmul %9, %10, %cst_10 {dimension_numbers = #tpu.dot_dimension_numbers<[1], [0], [0], [1], [0, 0, 1, 1], [], []>} : vector<16x512xbf16>, vector<512x128xbf16>, vector<16x128xf32> -> vector<16x128xf32>
    %c0_11 = arith.constant 0 : index
    %c0_12 = arith.constant 0 : index
    %12 = vector.load %arg5[%c0_11, %c0_12] : memref<1x128xf32, #tpu.memory_space<vmem>>, vector<1x128xf32>
    %13 = vector.broadcast %12 : vector<1x128xf32> to vector<16x128xf32>
    %14 = arith.addf %11, %13 : vector<16x128xf32>
    %c0_13 = arith.constant 0 : index
    %c0_14 = arith.constant 0 : index
    %15 = vector.load %arg6[%c0_13, %c0_14] : memref<16x128xf32, #tpu.memory_space<vmem>>, vector<16x128xf32>
    tpu.vector_store %arg6[%c0_13, %c0_14], %14 {strides = array<i32>} : memref<16x128xf32, #tpu.memory_space<vmem>>, vector<16x128xf32>,
    return
  }
  func.func @transform_0(%arg0: i32) -> (i32, i32) {
    %c0_i32 = arith.constant 0 : i32
    %c0_i32_0 = arith.constant 0 : i32
    return %arg0, %c0_i32 : i32, i32
  }
  func.func @transform_1(%arg0: i32) -> (i32, i32) {
    %c0_i32 = arith.constant 0 : i32
    %c0_i32_0 = arith.constant 0 : i32
    %c0_i32_1 = arith.constant 0 : i32
    return %c0_i32, %c0_i32_0 : i32, i32
  }
  func.func @transform_2(%arg0: i32) -> (i32, i32) {
    %c0_i32 = arith.constant 0 : i32
    %c0_i32_0 = arith.constant 0 : i32
    %c0_i32_1 = arith.constant 0 : i32
    return %c0_i32, %c0_i32_0 : i32, i32
  }
  func.func @transform_3(%arg0: i32) -> (i32, i32) {
    %c0_i32 = arith.constant 0 : i32
    %c0_i32_0 = arith.constant 0 : i32
    %c0_i32_1 = arith.constant 0 : i32
    return %c0_i32, %c0_i32_0 : i32, i32
  }
  func.func @transform_4(%arg0: i32) -> (i32, i32) {
    %c0_i32 = arith.constant 0 : i32
    %c0_i32_0 = arith.constant 0 : i32
    %c0_i32_1 = arith.constant 0 : i32
    return %c0_i32, %c0_i32_0 : i32, i32
  }
  func.func @transform_5(%arg0: i32) -> (i32, i32) {
    %c0_i32 = arith.constant 0 : i32
    %c0_i32_0 = arith.constant 0 : i32
    return %arg0, %c0_i32 : i32, i32
  }
  func.func @transform_6(%arg0: i32) -> (i32, i32) {
    %c0_i32 = arith.constant 0 : i32
    %c0_i32_0 = arith.constant 0 : i32
    return %arg0, %c0_i32 : i32, i32
  }
}

module attributes {stable_mosaic.version = 11 : i64} {
  func.func @kernel(%arg0: i32, %arg1: memref<16x128xbf16, #tpu.memory_space<vmem>>, %arg2: memref<128x512xbf16, #tpu.memory_space<vmem>>, %arg3: memref<1x512xf32, #tpu.memory_space<vmem>>, %arg4: memref<512x128xbf16, #tpu.memory_space<vmem>>, %arg5: memref<1x128xf32, #tpu.memory_space<vmem>>, %arg6: memref<16x128xf32, #tpu.memory_space<vmem>>, %arg7: memref<16x512xf32, #tpu.memory_space<vmem>>) attributes {dimension_semantics = [#tpu.dimension_semantics<parallel>], iteration_bounds = array<i64: 1>, scalar_prefetch = 0 : i64, scratch_operands = 0 : i64, tpu.core_type = #tpu.core_type<tc>, window_params = [{transform_indices = @transform_0, window_bounds = array<i64: 16, 128>}, {pipeline_mode = #tpu.pipeline_mode<synchronous>, transform_indices = @transform_1, window_bounds = array<i64: 128, 512>}, {pipeline_mode = #tpu.pipeline_mode<synchronous>, transform_indices = @transform_2, window_bounds = array<i64: 1, 512>}, {pipeline_mode = #tpu.pipeline_mode<synchronous>, transform_indices = @transform_3, window_bounds = array<i64: 512, 128>}, {pipeline_mode = #tpu.pipeline_mode<synchronous>, transform_indices = @transform_4, window_bounds = array<i64: 1, 128>}, {transform_indices = @transform_5, window_bounds = array<i64: 16, 128>}, {transform_indices = @transform_6, window_bounds = array<i64: 16, 512>}]} {
    %c0 = arith.constant 0 : index
    %c0_0 = arith.constant 0 : index
    %0 = vector.load %arg1[%c0, %c0_0] : memref<16x128xbf16, #tpu.memory_space<vmem>>, vector<16x128xbf16>
    %c0_1 = arith.constant 0 : index
    %c0_2 = arith.constant 0 : index
    %1 = vector.load %arg2[%c0_1, %c0_2] : memref<128x512xbf16, #tpu.memory_space<vmem>>, vector<128x512xbf16>
    %cst = arith.constant dense<0.000000e+00> : vector<16x512xf32>
    %2 = tpu.matmul %0, %1, %cst {dimension_numbers = #tpu.dot_dimension_numbers<[1], [0], [0], [1], [0, 0, 1, 1], [], []>} : vector<16x128xbf16>, vector<128x512xbf16>, vector<16x512xf32> -> vector<16x512xf32>
    %c0_3 = arith.constant 0 : index
    %c0_4 = arith.constant 0 : index
    %3 = vector.load %arg3[%c0_3, %c0_4] : memref<1x512xf32, #tpu.memory_space<vmem>>, vector<1x512xf32>
    %4 = vector.broadcast %3 : vector<1x512xf32> to vector<16x512xf32>
    %5 = arith.addf %2, %4 : vector<16x512xf32>
    %cst_5 = arith.constant 0.000000e+00 : f32
    %6 = vector.broadcast %cst_5 : f32 to vector<16x512xf32>
    %7 = arith.maximumf %5, %6 : vector<16x512xf32>
    %c0_6 = arith.constant 0 : index
    %c0_7 = arith.constant 0 : index
    %8 = vector.load %arg7[%c0_6, %c0_7] : memref<16x512xf32, #tpu.memory_space<vmem>>, vector<16x512xf32>
    tpu.vector_store %arg7[%c0_6, %c0_7], %7 {strides = array<i32>} : memref<16x512xf32, #tpu.memory_space<vmem>>, vector<16x512xf32>,
    %9 = arith.truncf %7 : vector<16x512xf32> to vector<16x512xbf16>
    %c0_8 = arith.constant 0 : index
    %c0_9 = arith.constant 0 : index
    %10 = vector.load %arg4[%c0_8, %c0_9] : memref<512x128xbf16, #tpu.memory_space<vmem>>, vector<512x128xbf16>
    %cst_10 = arith.constant dense<0.000000e+00> : vector<16x128xf32>
    %11 = tpu.matmul %9, %10, %cst_10 {dimension_numbers = #tpu.dot_dimension_numbers<[1], [0], [0], [1], [0, 0, 1, 1], [], []>} : vector<16x512xbf16>, vector<512x128xbf16>, vector<16x128xf32> -> vector<16x128xf32>
    %c0_11 = arith.constant 0 : index
    %c0_12 = arith.constant 0 : index
    %12 = vector.load %arg5[%c0_11, %c0_12] : memref<1x128xf32, #tpu.memory_space<vmem>>, vector<1x128xf32>
    %13 = vector.broadcast %12 : vector<1x128xf32> to vector<16x128xf32>
    %14 = arith.addf %11, %13 : vector<16x128xf32>
    %c0_13 = arith.constant 0 : index
    %c0_14 = arith.constant 0 : index
    %15 = vector.load %arg6[%c0_13, %c0_14] : memref<16x128xf32, #tpu.memory_space<vmem>>, vector<16x128xf32>
    tpu.vector_store %arg6[%c0_13, %c0_14], %14 {strides = array<i32>} : memref<16x128xf32, #tpu.memory_space<vmem>>, vector<16x128xf32>,
    return
  }
  func.func @transform_0(%arg0: i32) -> (i32, i32) {
    %c0_i32 = arith.constant 0 : i32
    %c0_i32_0 = arith.constant 0 : i32
    return %arg0, %c0_i32 : i32, i32
  }
  func.func @transform_1(%arg0: i32) -> (i32, i32) {
    %c0_i32 = arith.constant 0 : i32
    %c0_i32_0 = arith.constant 0 : i32
    %c0_i32_1 = arith.constant 0 : i32
    return %c0_i32, %c0_i32_0 : i32, i32
  }
  func.func @transform_2(%arg0: i32) -> (i32, i32) {
    %c0_i32 = arith.constant 0 : i32
    %c0_i32_0 = arith.constant 0 : i32
    %c0_i32_1 = arith.constant 0 : i32
    return %c0_i32, %c0_i32_0 : i32, i32
  }
  func.func @transform_3(%arg0: i32) -> (i32, i32) {
    %c0_i32 = arith.constant 0 : i32
    %c0_i32_0 = arith.constant 0 : i32
    %c0_i32_1 = arith.constant 0 : i32
    return %c0_i32, %c0_i32_0 : i32, i32
  }
  func.func @transform_4(%arg0: i32) -> (i32, i32) {
    %c0_i32 = arith.constant 0 : i32
    %c0_i32_0 = arith.constant 0 : i32
    %c0_i32_1 = arith.constant 0 : i32
    return %c0_i32, %c0_i32_0 : i32, i32
  }
  func.func @transform_5(%arg0: i32) -> (i32, i32) {
    %c0_i32 = arith.constant 0 : i32
    %c0_i32_0 = arith.constant 0 : i32
    return %arg0, %c0_i32 : i32, i32
  }
  func.func @transform_6(%arg0: i32) -> (i32, i32) {
    %c0_i32 = arith.constant 0 : i32
    %c0_i32_0 = arith.constant 0 : i32
    return %arg0, %c0_i32 : i32, i32
  }
}

</mosaic_0001>

<bundles_post_ra>
// kernel: tpu_custom_call.1
= control target key start
LH: loop header
LB: loop body
LE: loop exit
PB: predicated region body
PF: predicated region fallthrough
CT: control target
= control target key end

     0   :  { %12 = vsyncpa [#allocation3], 0  ;;  %s1305_s0 = inlined_call_operand.hbm [shape: bf16[16,128], index: 0, kind: input, shape index: {}]   ;;  %s1306_s1 = inlined_call_operand.hbm [shape: bf16[128,512], index: 1, kind: input, shape index: {}]   ;;  %s1307_s2 = inlined_call_operand.hbm [shape: f32[1,512], index: 2, kind: input, shape index: {}]   ;;  %s1308_s3 = inlined_call_operand.hbm [shape: bf16[512,128], index: 3, kind: input, shape index: {}]   ;;  %s1309_s4 = inlined_call_operand.hbm [shape: f32[1,128], index: 4, kind: input, shape index: {}]   ;;  %s1310_s5 = inlined_call_operand.hbm [shape: f32[16,128], index: 5, kind: output, shape index: {0}]   ;;  %s1311_s6 = inlined_call_operand.hbm [shape: f32[16,512], index: 6, kind: output, shape index: {1}]  }
   0x1   :  { %13 = vsyncpa [#allocation6], 0 }
   0x2   :  { %14 = vsyncpa [#allocation9], 0 }
   0x3   :  { %15 = vsyncpa [#allocation4], 0 }
   0x4   :  { %16 = vsyncpa [#allocation13], 0  ;;  %s1170_s21 = smov [#allocation5]   ;;  %s1006_s25 = scalar_lea.hbm %s1306_s1, 4096 }
   0x5   :  { %s34_s22 = sshll.u32 %s1170_s21, 4  ;;  %p1007_p0 = scmp.ne.s32.totalorder %s1306_s1, %s1006_s25  ;;  %s35_s22 = int_to_ptr.vmem [resolvable:$true] %s34_s22 }
   0x6   :  { %p1010_p1 = scmp.lt.u32.totalorder %s1006_s25, %s1306_s1 }
   0x8   :  { %p1012_p2 = pnand %p1010_p1, %p1007_p0 }
   0xa   :  { %1015 = shalt.err (!%p1012_p2)
}
   0xb   :  { %s1016_s30 = scalar_lea.vmem %s35_s22, 4096  ;;  %p1021_p4 = scmp.lt.s32.totalorder %s35_s22, %s35_s22 }
   0xc   :  { %p1017_p3 = scmp.ne.s32.totalorder %s35_s22, %s1016_s30  ;;  %p1022_p5 = scmp.lt.s32.totalorder %s1016_s30, %s1016_s30 }
   0xe   :  { %p1023_p6 = por %p1022_p5, %p1021_p4 }
  0x10   :  { %p1024_p7 = pnand %p1023_p6, %p1017_p3 }
  0x12   :  { %1027 = shalt.err (!%p1024_p7)
}
  0x13   :  { %s1171_s7 = smov 256   ;;  %s1172_s8 = smov 16  }
  0x14   :  { %40 = dma.hbm_to_vmem [thread:$0]  %s1306_s1, 4096, %s35_s22, [#allocation6], %s1171_s7, %s1171_s7, %s1172_s8  }
  0x15   :  { %s1173_s11 = smov [#allocation8]   ;;  %s1174_s13 = smov [#allocation2]  }
  0x16   :  { %s56_s12 = sshll.u32 %s1173_s11, 4  ;;  %s22_s14 = sshll.u32 %s1174_s13, 4  ;;  %s57_s12 = int_to_ptr.vmem [resolvable:$true] %s56_s12  ;;  %s23_s14 = int_to_ptr.vmem [resolvable:$true] %s22_s14 }
  0x17   :  { %s1028_s17 = scalar_lea.hbm %s1308_s3, 4096 }
  0x18   :  { %p1029_p8 = scmp.ne.s32.totalorder %s1308_s3, %s1028_s17  ;;  %p1032_p9 = scmp.lt.u32.totalorder %s1028_s17, %s1308_s3 }
  0x1a   :  { %p1034_p10 = pnand %p1032_p9, %p1029_p8 }
  0x1c   :  { %1037 = shalt.err (!%p1034_p10)
}
  0x1d   :  { %s1038_s1 = scalar_lea.vmem %s57_s12, 4096  ;;  %p1043_p12 = scmp.lt.s32.totalorder %s57_s12, %s57_s12 }
  0x1e   :  { %p1039_p11 = scmp.ne.s32.totalorder %s57_s12, %s1038_s1  ;;  %p1044_p13 = scmp.lt.s32.totalorder %s1038_s1, %s1038_s1 }
  0x20   :  { %p1045_p0 = por %p1044_p13, %p1043_p12 }
  0x22   :  { %p1046_p1 = pnand %p1045_p0, %p1039_p11 }
  0x24   :  { %1049 = shalt.err (!%p1046_p1)
}
  0x25   :  { %s1175_s22 = smov 64   ;;  %s1176_s23 = smov 4  }
  0x26   :  { %62 = dma.hbm_to_vmem [thread:$0]  %s1308_s3, 4096, %s57_s12, [#allocation9], %s1175_s22, %s1175_s22, %s1176_s23  }
  0x27   :  { %s1050_s28 = scalar_lea.hbm %s1305_s0, 128 }
  0x28   :  { %p1051_p2 = scmp.ne.s32.totalorder %s1305_s0, %s1050_s28  ;;  %p1054_p3 = scmp.lt.u32.totalorder %s1050_s28, %s1305_s0 }
  0x2a   :  { %p1056_p4 = pnand %p1054_p3, %p1051_p2 }
  0x2c   :  { %1059 = shalt.err (!%p1056_p4)
}
  0x2d   :  { %s1060_s9 = scalar_lea.vmem %s23_s14, 128  ;;  %p1065_p6 = scmp.lt.s32.totalorder %s23_s14, %s23_s14 }
  0x2e   :  { %p1061_p5 = scmp.ne.s32.totalorder %s23_s14, %s1060_s9  ;;  %p1066_p7 = scmp.lt.s32.totalorder %s1060_s9, %s1060_s9 }
  0x30   :  { %p1067_p8 = por %p1066_p7, %p1065_p6 }
  0x32   :  { %p1068_p9 = pnand %p1067_p8, %p1061_p5 }
  0x34   :  { %1071 = shalt.err (!%p1068_p9)
}
  0x35   :  { %28 = dma.hbm_to_vmem [thread:$0]  %s1305_s0, 128, %s23_s14, [#allocation3], %s1175_s22, %s1175_s22, %s1176_s23  }
  0x36   :  { %s1177_s11 = smov [#allocation7]   ;;  %s1178_s13 = smov [#allocation10]  }
  0x37   :  { %s47_s12 = sshll.u32 %s1177_s11, 4  ;;  %s69_s15 = sshll.u32 %s1178_s13, 4  ;;  %s48_s12 = int_to_ptr.vmem [resolvable:$true] %s47_s12  ;;  %s70_s15 = int_to_ptr.vmem [resolvable:$true] %s69_s15 }
  0x38   :  { %s1072_s18 = scalar_lea.hbm %s1307_s2, 64 }
  0x39   :  { %p1073_p10 = scmp.ne.s32.totalorder %s1307_s2, %s1072_s18  ;;  %p1076_p11 = scmp.lt.u32.totalorder %s1072_s18, %s1307_s2 }
  0x3b   :  { %p1078_p12 = pnand %p1076_p11, %p1073_p10 }
  0x3d   :  { %1081 = shalt.err (!%p1078_p12)
}
  0x3e   :  { %s1082_s0 = scalar_lea.vmem %s48_s12, 64  ;;  %p1087_p0 = scmp.lt.s32.totalorder %s48_s12, %s48_s12 }
  0x3f   :  { %p1083_p13 = scmp.ne.s32.totalorder %s48_s12, %s1082_s0  ;;  %p1088_p1 = scmp.lt.s32.totalorder %s1082_s0, %s1082_s0 }
  0x41   :  { %p1089_p2 = por %p1088_p1, %p1087_p0 }
  0x43   :  { %p1090_p3 = pnand %p1089_p2, %p1083_p13 }
  0x45   :  { %1093 = shalt.err (!%p1090_p3)
}
  0x46   :  { %50 = dma.hbm_to_vmem [thread:$0]  %s1307_s2, 64, %s48_s12, [#allocation6]  }
  0x47   :  { %s1094_s25 = scalar_lea.hbm %s1309_s4, 16 }
  0x48   :  { %p1095_p4 = scmp.ne.s32.totalorder %s1309_s4, %s1094_s25  ;;  %p1098_p5 = scmp.lt.u32.totalorder %s1094_s25, %s1309_s4 }
  0x4a   :  { %p1100_p6 = pnand %p1098_p5, %p1095_p4 }
  0x4c   :  { %1103 = shalt.err (!%p1100_p6)
}
  0x4d   :  { %s1104_s30 = scalar_lea.vmem %s70_s15, 16  ;;  %s1108_s7 = scalar_lea.vmem %s70_s15, 32 }
  0x4e   :  { %p1105_p7 = scmp.ne.s32.totalorder %s70_s15, %s1104_s30  ;;  %p1109_p8 = scmp.lt.s32.totalorder %s70_s15, %s70_s15 }
  0x4f   :  { %p1110_p9 = scmp.lt.s32.totalorder %s1108_s7, %s1104_s30 }
  0x51   :  { %p1111_p10 = por %p1110_p9, %p1109_p8 }
  0x53   :  { %p1112_p11 = pnand %p1111_p10, %p1105_p7 }
  0x55   :  { %1115 = shalt.err (!%p1112_p11)
}
  0x56   :  { %72 = dma.hbm_to_vmem [thread:$0]  %s1309_s4, 16, %s70_s15, [#allocation9]  }
  0x57   :  { %1160 = dma.done.wait [#allocation3], 128  }
  0x58   :  { %1161 = vsyncadd [#allocation3], 4294967168 }
  0x59   :  { %1162 = dma.done.wait [#allocation6], 4160  }
  0x5a   :  { %1163 = vsyncadd [#allocation6], 4294963136 }
  0x5b   :  { %1164 = dma.done.wait [#allocation9], 4112  }
  0x5c   :  { %1165 = vsyncadd [#allocation9], 4294963184  ;;  %v1179_v0 = vmov 0   ;;  %v925_v1 = vld [vmem:[#allocation5 + $0x4] ss:$16 sps:$4 sm:$0xff]   ;;  %v973_v34 = vld [vmem:[#allocation2] sm:$0xff]  }
  0x5d   :  { %343 = vmatprep.mubr.bf16.mxu0 %v1179_v0  ;;  %386 = vmatprep.mubr.bf16.mxu1 %v1179_v0  ;;  %v927_v2 = vld [vmem:[#allocation5 + $0xc] ss:$16 sps:$4 sm:$0xff]   ;;  %v929_v3 = vld [vmem:[#allocation5] ss:$16 sps:$4 sm:$0xff]   ;;  %v930_v4 = vld [vmem:[#allocation5 + $0x8] ss:$16 sps:$4 sm:$0xff]  }
  0x5e   :  { %311 = vmatprep.subr.bf16.mxu0 %v925_v1  ;;  %354 = vmatprep.subr.bf16.mxu1 %v927_v2  ;;  %v931_v5 = vld [vmem:[#allocation5 + $0x24] ss:$16 sps:$4 sm:$0xff]   ;;  %v933_v6 = vld [vmem:[#allocation5 + $0x2c] ss:$16 sps:$4 sm:$0xff]   ;;  %v935_v7 = vld [vmem:[#allocation5 + $0x20] ss:$16 sps:$4 sm:$0xff]   ;;  %v125_v2 = vlaneseq }
  0x5f   :  { %312 = vmatpush1.bf16.msra.mxu0 %v929_v3  ;;  %355 = vmatpush1.bf16.msra.mxu1 %v930_v4  ;;  %v936_v8 = vld [vmem:[#allocation5 + $0x28] ss:$16 sps:$4 sm:$0xff]   ;;  %v937_v9 = vld [vmem:[#allocation5 + $0x44] ss:$16 sps:$4 sm:$0xff]   ;;  %v939_v10 = vld [vmem:[#allocation5 + $0x4c] ss:$16 sps:$4 sm:$0xff]  }
  0x60   :  { %313 = vmatprep.subr.bf16.mxu0 %v931_v5  ;;  %356 = vmatprep.subr.bf16.mxu1 %v933_v6  ;;  %v941_v11 = vld [vmem:[#allocation5 + $0x40] ss:$16 sps:$4 sm:$0xff]   ;;  %v942_v12 = vld [vmem:[#allocation5 + $0x48] ss:$16 sps:$4 sm:$0xff]   ;;  %v943_v13 = vld [vmem:[#allocation5 + $0x64] ss:$16 sps:$4 sm:$0xff]  }
  0x61   :  { %v945_v14 = vld [vmem:[#allocation5 + $0x6c] ss:$16 sps:$4 sm:$0xff]   ;;  %v947_v15 = vld [vmem:[#allocation5 + $0x60] ss:$16 sps:$4 sm:$0xff]   ;;  %v948_v16 = vld [vmem:[#allocation5 + $0x68] ss:$16 sps:$4 sm:$0xff]  }
  0x62   :  { %v949_v17 = vld [vmem:[#allocation5 + $0x84] ss:$16 sps:$4 sm:$0xff]   ;;  %v951_v18 = vld [vmem:[#allocation5 + $0x8c] ss:$16 sps:$4 sm:$0xff]   ;;  %v953_v19 = vld [vmem:[#allocation5 + $0x80] ss:$16 sps:$4 sm:$0xff]  }
  0x63   :  { %314 = vmatpush1.bf16.msra.mxu0 %v935_v7  ;;  %357 = vmatpush1.bf16.msra.mxu1 %v936_v8  ;;  %v954_v20 = vld [vmem:[#allocation5 + $0x88] ss:$16 sps:$4 sm:$0xff]   ;;  %v955_v21 = vld [vmem:[#allocation5 + $0xa4] ss:$16 sps:$4 sm:$0xff]   ;;  %v957_v22 = vld [vmem:[#allocation5 + $0xac] ss:$16 sps:$4 sm:$0xff]  }
  0x64   :  { %315 = vmatprep.subr.bf16.mxu0 %v937_v9  ;;  %358 = vmatprep.subr.bf16.mxu1 %v939_v10  ;;  %v959_v23 = vld [vmem:[#allocation5 + $0xa0] ss:$16 sps:$4 sm:$0xff]   ;;  %v960_v24 = vld [vmem:[#allocation5 + $0xa8] ss:$16 sps:$4 sm:$0xff]   ;;  %v961_v25 = vld [vmem:[#allocation5 + $0xc4] ss:$16 sps:$4 sm:$0xff]  }
  0x65   :  { %v963_v26 = vld [vmem:[#allocation5 + $0xcc] ss:$16 sps:$4 sm:$0xff]   ;;  %v965_v27 = vld [vmem:[#allocation5 + $0xc0] ss:$16 sps:$4 sm:$0xff]   ;;  %v966_v28 = vld [vmem:[#allocation5 + $0xc8] ss:$16 sps:$4 sm:$0xff]  }
  0x66   :  { %v967_v29 = vld [vmem:[#allocation5 + $0xe4] ss:$16 sps:$4 sm:$0xff]   ;;  %v969_v30 = vld [vmem:[#allocation5 + $0xec] ss:$16 sps:$4 sm:$0xff]   ;;  %v971_v31 = vld [vmem:[#allocation5 + $0xe0] ss:$16 sps:$4 sm:$0xff]  }
  0x67   :  { %316 = vmatpush1.bf16.msra.mxu0 %v941_v11  ;;  %359 = vmatpush1.bf16.msra.mxu1 %v942_v12  ;;  %v972_v32 = vld [vmem:[#allocation5 + $0xe8] ss:$16 sps:$4 sm:$0xff]   ;;  %v978_v38 = vld [vmem:[#allocation8 + $0x48] sm:$0xff]   ;;  %v986_v46 = vld [vmem:[#allocation8 + $0x58] sm:$0xff]   ;;  %v126_v3 = vshrl.u32 %v125_v2, 7  ;;  %s1180_s4 = smov [#allocation12]  }
  0x68   :  { %317 = vmatprep.subr.bf16.mxu0 %v943_v13  ;;  %360 = vmatprep.subr.bf16.mxu1 %v945_v14  ;;  %v974_v33 = vld [vmem:[#allocation8 + $0x40] sm:$0xff]   ;;  %v979_v39 = vld [vmem:[#allocation8 + $0xc8] sm:$0xff]   ;;  %v982_v42 = vld [vmem:[#allocation8 + $0x50] sm:$0xff]   ;;  %s781_s9 = sshll.u32 %s1180_s4, 4  ;;  %s782_s9 = int_to_ptr.vmem [resolvable:$true] %s781_s9 }
  0x69   :  { %v975_v35 = vld [vmem:[#allocation8 + $0xc0] sm:$0xff]   ;;  %v980_v40 = vld [vmem:[#allocation8 + $0x8] sm:$0xff]   ;;  %v983_v43 = vld [vmem:[#allocation8 + $0xd0] sm:$0xff]   ;;  %v127_v4 = vsub.s32 0, %v126_v3  ;;  %v135_v5 = vsub.s32 2, %v126_v3  ;;  %v131_v7 = vsub.s32 1, %v126_v3  ;;  %p1121_p13 = scmp.lt.s32.totalorder %s782_s9, %s782_s9 }
  0x6a   :  { %v976_v36 = vld [vmem:[#allocation8] sm:$0xff]   ;;  %v981_v41 = vld [vmem:[#allocation8 + $0x88] sm:$0xff]   ;;  %v984_v44 = vld [vmem:[#allocation8 + $0x10] sm:$0xff]   ;;  %v139_v8 = vsub.s32 3, %v126_v3  ;;  %s1116_s3 = scalar_lea.vmem %s782_s9, 1024 }
  0x6b   :  { %318 = vmatpush1.bf16.msra.mxu0 %v947_v15  ;;  %361 = vmatpush1.bf16.msra.mxu1 %v948_v16  ;;  %v977_v37 = vld [vmem:[#allocation8 + $0x80] sm:$0xff]   ;;  %v985_v45 = vld [vmem:[#allocation8 + $0x90] sm:$0xff]   ;;  %v987_v47 = vld [vmem:[#allocation8 + $0xd8] sm:$0xff]   ;;  %p1117_p12 = scmp.ne.s32.totalorder %s782_s9, %s1116_s3  ;;  %p1122_p0 = scmp.lt.s32.totalorder %s1116_s3, %s1116_s3 }
  0x6c   :  { %319 = vmatprep.subr.bf16.mxu0 %v949_v17  ;;  %362 = vmatprep.subr.bf16.mxu1 %v951_v18  ;;  %v988_v48 = vld [vmem:[#allocation8 + $0x18] sm:$0xff]   ;;  %v990_v50 = vld [vmem:[#allocation8 + $0x60] sm:$0xff]   ;;  %v994_v54 = vld [vmem:[#allocation8 + $0x68] sm:$0xff]  }
  0x6d   :  { %v989_v49 = vld [vmem:[#allocation8 + $0x98] sm:$0xff]   ;;  %v991_v51 = vld [vmem:[#allocation8 + $0xe0] sm:$0xff]   ;;  %v995_v55 = vld [vmem:[#allocation8 + $0xe8] sm:$0xff]   ;;  %p1123_p1 = por %p1122_p0, %p1121_p13 }
  0x6e   :  { %v992_v52 = vld [vmem:[#allocation8 + $0x20] sm:$0xff]   ;;  %v996_v56 = vld [vmem:[#allocation8 + $0x28] sm:$0xff]   ;;  %v998_v58 = vld [vmem:[#allocation8 + $0x70] sm:$0xff]  }
  0x6f   :  { %320 = vmatpush1.bf16.msra.mxu0 %v953_v19  ;;  %363 = vmatpush1.bf16.msra.mxu1 %v954_v20  ;;  %v993_v53 = vld [vmem:[#allocation8 + $0xa0] sm:$0xff]   ;;  %v997_v57 = vld [vmem:[#allocation8 + $0xa8] sm:$0xff]   ;;  %v999_v59 = vld [vmem:[#allocation8 + $0xf0] sm:$0xff]   ;;  %p1124_p2 = pnand %p1123_p1, %p1117_p12 }
  0x70   :  { %321 = vmatprep.subr.bf16.mxu0 %v955_v21  ;;  %364 = vmatprep.subr.bf16.mxu1 %v957_v22  ;;  %v1000_v60 = vld [vmem:[#allocation8 + $0x30] sm:$0xff]   ;;  %v1002_v62 = vld [vmem:[#allocation8 + $0x78] sm:$0xff]  }
  0x71   :  { %v1001_v61 = vld [vmem:[#allocation8 + $0xb0] sm:$0xff]   ;;  %v1003_v63 = vld [vmem:[#allocation8 + $0xf8] sm:$0xff]  }
  0x72   :  { %v1004_v0 = vld [vmem:[#allocation8 + $0x38] sm:$0xff]  }
  0x73   :  { %322 = vmatpush1.bf16.msra.mxu0 %v959_v23  ;;  %365 = vmatpush1.bf16.msra.mxu1 %v960_v24  ;;  %v1005_v1 = vld [vmem:[#allocation8 + $0xb8] sm:$0xff]  }
  0x74   :  { %323 = vmatprep.subr.bf16.mxu0 %v961_v25  ;;  %366 = vmatprep.subr.bf16.mxu1 %v963_v26  ;;  %v123_v6 = vld [vmem:[#allocation7] sm:$0xf] }
  0x75   :  { %v128_v9 = vrot.slane %v123_v6, %v127_v4  ;;  %v136_v10 = vrot.slane %v123_v6, %v135_v5  ;;  %v132_v11 = vrot.slane %v123_v6, %v131_v7  ;;  %v140_v12 = vrot.slane %v123_v6, %v139_v8 }
  0x77   :  { %324 = vmatpush1.bf16.msra.mxu0 %v965_v27  ;;  %367 = vmatpush1.bf16.msra.mxu1 %v966_v28 }
  0x78   :  { %325 = vmatprep.subr.bf16.mxu0 %v967_v29  ;;  %368 = vmatprep.subr.bf16.mxu1 %v969_v30 }
  0x7b   :  { %326 = vmatpush1.bf16.msra.mxu0 %v971_v31  ;;  %369 = vmatpush1.bf16.msra.mxu1 %v972_v32 }
  0x7c   :  { %865 = vmatprep.subr.bf16.mxu0 %v974_v33  ;;  %887 = vmatprep.subr.bf16.mxu1 %v975_v35 }
  0x7e   :  { %344 = vmatmul.mubr.bf16.vlgmr.msra.gmra.mrb[0].mxu0 %v973_v34  ;;  %387 = vmatmul.mubr.bf16.vlgmr.msra.gmra.mrb[0].mxu1 %v973_v34 }
  0x7f   :  { %866 = vmatpush3.bf16.msra.mxu0 %v976_v36  ;;  %888 = vmatpush3.bf16.msra.mxu1 %v977_v37 }
  0x80   :  { %867 = vmatprep.subr.bf16.mxu0 %v978_v38  ;;  %889 = vmatprep.subr.bf16.mxu1 %v979_v39 }
  0x83   :  { %868 = vmatpush3.bf16.msra.mxu0 %v980_v40  ;;  %890 = vmatpush3.bf16.msra.mxu1 %v981_v41 }
  0x84   :  { %869 = vmatprep.subr.bf16.mxu0 %v982_v42  ;;  %891 = vmatprep.subr.bf16.mxu1 %v983_v43 }
  0x87   :  { %870 = vmatpush3.bf16.msra.mxu0 %v984_v44  ;;  %892 = vmatpush3.bf16.msra.mxu1 %v985_v45 }
  0x88   :  { %871 = vmatprep.subr.bf16.mxu0 %v986_v46  ;;  %893 = vmatprep.subr.bf16.mxu1 %v987_v47 }
  0x8b   :  { %872 = vmatpush3.bf16.msra.mxu0 %v988_v48  ;;  %894 = vmatpush3.bf16.msra.mxu1 %v989_v49 }
  0x8c   :  { %873 = vmatprep.subr.bf16.mxu0 %v990_v50  ;;  %895 = vmatprep.subr.bf16.mxu1 %v991_v51 }
  0x8f   :  { %874 = vmatpush3.bf16.msra.mxu0 %v992_v52  ;;  %896 = vmatpush3.bf16.msra.mxu1 %v993_v53 }
  0x90   :  { %875 = vmatprep.subr.bf16.mxu0 %v994_v54  ;;  %897 = vmatprep.subr.bf16.mxu1 %v995_v55 }
  0x93   :  { %876 = vmatpush3.bf16.msra.mxu0 %v996_v56  ;;  %898 = vmatpush3.bf16.msra.mxu1 %v997_v57 }
  0x94   :  { %877 = vmatprep.subr.bf16.mxu0 %v998_v58  ;;  %899 = vmatprep.subr.bf16.mxu1 %v999_v59 }
  0x97   :  { %878 = vmatpush3.bf16.msra.mxu0 %v1000_v60  ;;  %900 = vmatpush3.bf16.msra.mxu1 %v1001_v61 }
  0x98   :  { %879 = vmatprep.subr.bf16.mxu0 %v1002_v62  ;;  %901 = vmatprep.subr.bf16.mxu1 %v1003_v63 }
  0x9b   :  { %880 = vmatpush3.bf16.msra.mxu0 %v1004_v0  ;;  %902 = vmatpush3.bf16.msra.mxu1 %v1005_v1 }
 0x151   :  { %v345_v13 = vpop.f32.mrb[0].mxu0  ;;  %v388_v14 = vpop.f32.mrb[0].mxu1 }
 0x152   :  { %v346_v15 = vadd.f32 %v345_v13, %v128_v9  ;;  %v389_v16 = vadd.f32 %v388_v14, %v136_v10  ;;  %v347_v17 = vpop.f32.mrb[1].mxu0  ;;  %v390_v18 = vpop.f32.mrb[1].mxu1 }
 0x153   :  { %v348_v19 = vadd.f32 %v347_v17, %v132_v11  ;;  %v391_v20 = vadd.f32 %v390_v18, %v140_v12  ;;  %v349_v21 = vpop.f32.mrb[2].mxu0  ;;  %v392_v22 = vpop.f32.mrb[2].mxu1 }
 0x154   :  { %v397_v23 = vmax.f32 %v346_v15, 0.0  ;;  %v399_v24 = vmax.f32 %v389_v16, 0.0  ;;  %v350_v25 = vadd.f32 %v349_v21, %v128_v9  ;;  %v393_v26 = vadd.f32 %v392_v22, %v136_v10  ;;  %v351_v27 = vpop.f32.mrb[3].mxu0  ;;  %v394_v28 = vpop.f32.mrb[3].mxu1 }
 0x155   :  { %v398_v29 = vmax.f32 %v348_v19, 0.0  ;;  %v400_v30 = vmax.f32 %v391_v20, 0.0  ;;  %v352_v31 = vadd.f32 %v351_v27, %v132_v11  ;;  %v395_v32 = vadd.f32 %v394_v28, %v140_v12 }
 0x156   :  { %405 = vst [vmem:[#allocation12] sm:$0xff] %v397_v23  ;;  %407 = vst [vmem:[#allocation12 + $0x10] sm:$0xff] %v399_v24  ;;  %v401_v33 = vmax.f32 %v350_v25, 0.0  ;;  %v403_v34 = vmax.f32 %v393_v26, 0.0 }
 0x157   :  { %406 = vst [vmem:[#allocation12 + $0x8] sm:$0xff] %v398_v29  ;;  %408 = vst [vmem:[#allocation12 + $0x18] sm:$0xff] %v400_v30  ;;  %v402_v35 = vmax.f32 %v352_v31, 0.0  ;;  %v404_v36 = vmax.f32 %v395_v32, 0.0 }
 0x158   :  { %409 = vst [vmem:[#allocation12 + $0x20] sm:$0xff] %v401_v33  ;;  %v413_v37 = vpack.c.bf16 %v401_v33, %v397_v23  ;;  %411 = vst [vmem:[#allocation12 + $0x30] sm:$0xff] %v403_v34  ;;  %v415_v38 = vpack.c.bf16 %v403_v34, %v399_v24 }
 0x159   :  { %410 = vst [vmem:[#allocation12 + $0x28] sm:$0xff] %v402_v35  ;;  %v414_v39 = vpack.c.bf16 %v402_v35, %v398_v29  ;;  %412 = vst [vmem:[#allocation12 + $0x38] sm:$0xff] %v404_v36  ;;  %v416_v40 = vpack.c.bf16 %v404_v36, %v400_v30 }
 0x15b   :  { %712 = vmatprep.mubr.bf16.mxu0 %v414_v39  ;;  %753 = vmatprep.mubr.bf16.mxu1 %v416_v40 }
 0x15c   :  { %713 = vmatmul.mubr.bf16.vlgmr.msra.gmra.mrb[4].mxu0 %v413_v37  ;;  %754 = vmatmul.mubr.bf16.vlgmr.msra.gmra.mrb[4].mxu1 %v415_v38 }
 0x15d   :  { %1127 = shalt.err (!%p1124_p2)
}
 0x15e   :  { %s1128_s12 = scalar_lea.hbm %s1311_s6, 1024 }
 0x15f   :  { %p1129_p3 = scmp.ne.s32.totalorder %s1311_s6, %s1128_s12  ;;  %p1132_p4 = scmp.lt.u32.totalorder %s1128_s12, %s1311_s6 }
 0x161   :  { %p1134_p5 = pnand %p1132_p4, %p1129_p3 }
 0x163   :  { %1137 = shalt.err (!%p1134_p5)
}
 0x164   :  { %s1181_s18 = smov 512   ;;  %s1182_s19 = smov 32   ;;  %v832_v43 = vld [vmem:[#allocation10] ss:$0 sm:$0xff] }
 0x165   :  { %787 = dma.vmem_to_hbm [thread:$0]  %s782_s9, 1024, %s1311_s6, [#allocation13], %s1181_s18, %s1181_s18, %s1182_s19  }
 0x166   :  { %s1183_s1 = smov [#allocation11]  }
 0x167   :  { %s769_s0 = sshll.u32 %s1183_s1, 4  ;;  %s770_s0 = int_to_ptr.vmem [resolvable:$true] %s769_s0 }
 0x168   :  { %s1138_s6 = scalar_lea.vmem %s770_s0, 256  ;;  %p1143_p7 = scmp.lt.s32.totalorder %s770_s0, %s770_s0 }
 0x169   :  { %p1139_p6 = scmp.ne.s32.totalorder %s770_s0, %s1138_s6  ;;  %p1144_p8 = scmp.lt.s32.totalorder %s1138_s6, %s1138_s6 }
 0x16b   :  { %p1145_p9 = por %p1144_p8, %p1143_p7 }
 0x16d   :  { %p1146_p10 = pnand %p1145_p9, %p1139_p6 }
 0x22f   :  { %v881_v41 = vpop.f32.mrb[4].mxu0  ;;  %v903_v42 = vpop.f32.mrb[4].mxu1 }
 0x230   :  { %v882_v44 = vpop.f32.mrb[5].mxu0  ;;  %v904_v45 = vpop.f32.mrb[5].mxu1 }
 0x231   :  { %v883_v46 = vadd.f32 %v882_v44, %v881_v41  ;;  %v905_v47 = vadd.f32 %v904_v45, %v903_v42  ;;  %v884_v48 = vpop.f32.mrb[6].mxu0  ;;  %v906_v49 = vpop.f32.mrb[6].mxu1 }
 0x232   :  { %v885_v50 = vpop.f32.mrb[7].mxu0  ;;  %v907_v51 = vpop.f32.mrb[7].mxu1 }
 0x233   :  { %v715_v52 = vadd.f32 %v883_v46, %v832_v43  ;;  %v886_v53 = vadd.f32 %v885_v50, %v884_v48  ;;  %v908_v54 = vadd.f32 %v907_v51, %v906_v49 }
 0x235   :  { %v756_v55 = vadd.f32 %v905_v47, %v715_v52  ;;  %v718_v56 = vadd.f32 %v886_v53, %v832_v43 }
 0x237   :  { %762 = vst [vmem:[#allocation11] sm:$0xff] %v756_v55  ;;  %v759_v57 = vadd.f32 %v908_v54, %v718_v56 }
 0x239   :  { %763 = vst [vmem:[#allocation11 + $0x8] sm:$0xff] %v759_v57 }
 0x23a   :  { %1149 = shalt.err (!%p1146_p10)
}
 0x23b   :  { %s1150_s23 = scalar_lea.hbm %s1310_s5, 256 }
 0x23c   :  { %p1151_p11 = scmp.ne.s32.totalorder %s1310_s5, %s1150_s23  ;;  %p1154_p12 = scmp.lt.u32.totalorder %s1150_s23, %s1310_s5 }
 0x23e   :  { %p1156_p13 = pnand %p1154_p12, %p1151_p11 }
 0x240   :  { %1159 = shalt.err (!%p1156_p13)
}
 0x241   :  { %s1184_s28 = smov 128   ;;  %s1185_s29 = smov 8  }
 0x242   :  { %775 = dma.vmem_to_hbm [thread:$0]  %s770_s0, 256, %s1310_s5, [#allocation4], %s1184_s28, %s1184_s28, %s1185_s29  }
 0x243   :  { %1166 = dma.done.wait [#allocation4], 256  }
 0x244   :  { %1167 = vsyncadd [#allocation4], 4294967040 }
 0x245   :  { %1168 = dma.done.wait [#allocation13], 1024  }
 0x246   :  { %1169 = vsyncadd [#allocation13], 4294966272 }
 0x247   :  { %794 = vsyncpa [#allocation3], 1 }
 0x248   :  { %795 = vsyncpa [#allocation6], 1 }
 0x249   :  { %796 = vsyncpa [#allocation9], 1 }
 0x24a   :  { %797 = vsyncpa [#allocation4], 1 }
 0x24b   :  { %798 = vsyncpa [#allocation13], 1 }

// kernel: tpu_custom_call.1
= control target key start
LH: loop header
LB: loop body
LE: loop exit
PB: predicated region body
PF: predicated region fallthrough
CT: control target
= control target key end

     0   :  { %12 = vsyncpa [#allocation3], 0  ;;  %s1305_s0 = inlined_call_operand.hbm [shape: bf16[16,128], index: 0, kind: input, shape index: {}]   ;;  %s1306_s1 = inlined_call_operand.hbm [shape: bf16[128,512], index: 1, kind: input, shape index: {}]   ;;  %s1307_s2 = inlined_call_operand.hbm [shape: f32[1,512], index: 2, kind: input, shape index: {}]   ;;  %s1308_s3 = inlined_call_operand.hbm [shape: bf16[512,128], index: 3, kind: input, shape index: {}]   ;;  %s1309_s4 = inlined_call_operand.hbm [shape: f32[1,128], index: 4, kind: input, shape index: {}]   ;;  %s1310_s5 = inlined_call_operand.hbm [shape: f32[16,128], index: 5, kind: output, shape index: {0}]   ;;  %s1311_s6 = inlined_call_operand.hbm [shape: f32[16,512], index: 6, kind: output, shape index: {1}]  }
   0x1   :  { %13 = vsyncpa [#allocation6], 0 }
   0x2   :  { %14 = vsyncpa [#allocation9], 0 }
   0x3   :  { %15 = vsyncpa [#allocation4], 0 }
   0x4   :  { %16 = vsyncpa [#allocation13], 0  ;;  %s1170_s21 = smov [#allocation5]   ;;  %s1006_s25 = scalar_lea.hbm %s1306_s1, 4096 }
   0x5   :  { %s34_s22 = sshll.u32 %s1170_s21, 4  ;;  %p1007_p0 = scmp.ne.s32.totalorder %s1306_s1, %s1006_s25  ;;  %s35_s22 = int_to_ptr.vmem [resolvable:$true] %s34_s22 }
   0x6   :  { %p1010_p1 = scmp.lt.u32.totalorder %s1006_s25, %s1306_s1 }
   0x8   :  { %p1012_p2 = pnand %p1010_p1, %p1007_p0 }
   0xa   :  { %1015 = shalt.err (!%p1012_p2)
}
   0xb   :  { %s1016_s30 = scalar_lea.vmem %s35_s22, 4096  ;;  %p1021_p4 = scmp.lt.s32.totalorder %s35_s22, %s35_s22 }
   0xc   :  { %p1017_p3 = scmp.ne.s32.totalorder %s35_s22, %s1016_s30  ;;  %p1022_p5 = scmp.lt.s32.totalorder %s1016_s30, %s1016_s30 }
   0xe   :  { %p1023_p6 = por %p1022_p5, %p1021_p4 }
  0x10   :  { %p1024_p7 = pnand %p1023_p6, %p1017_p3 }
  0x12   :  { %1027 = shalt.err (!%p1024_p7)
}
  0x13   :  { %s1171_s7 = smov 256   ;;  %s1172_s8 = smov 16  }
  0x14   :  { %40 = dma.hbm_to_vmem [thread:$0]  %s1306_s1, 4096, %s35_s22, [#allocation6], %s1171_s7, %s1171_s7, %s1172_s8  }
  0x15   :  { %s1173_s11 = smov [#allocation8]   ;;  %s1174_s13 = smov [#allocation2]  }
  0x16   :  { %s56_s12 = sshll.u32 %s1173_s11, 4  ;;  %s22_s14 = sshll.u32 %s1174_s13, 4  ;;  %s57_s12 = int_to_ptr.vmem [resolvable:$true] %s56_s12  ;;  %s23_s14 = int_to_ptr.vmem [resolvable:$true] %s22_s14 }
  0x17   :  { %s1028_s17 = scalar_lea.hbm %s1308_s3, 4096 }
  0x18   :  { %p1029_p8 = scmp.ne.s32.totalorder %s1308_s3, %s1028_s17  ;;  %p1032_p9 = scmp.lt.u32.totalorder %s1028_s17, %s1308_s3 }
  0x1a   :  { %p1034_p10 = pnand %p1032_p9, %p1029_p8 }
  0x1c   :  { %1037 = shalt.err (!%p1034_p10)
}
  0x1d   :  { %s1038_s1 = scalar_lea.vmem %s57_s12, 4096  ;;  %p1043_p12 = scmp.lt.s32.totalorder %s57_s12, %s57_s12 }
  0x1e   :  { %p1039_p11 = scmp.ne.s32.totalorder %s57_s12, %s1038_s1  ;;  %p1044_p13 = scmp.lt.s32.totalorder %s1038_s1, %s1038_s1 }
  0x20   :  { %p1045_p0 = por %p1044_p13, %p1043_p12 }
  0x22   :  { %p1046_p1 = pnand %p1045_p0, %p1039_p11 }
  0x24   :  { %1049 = shalt.err (!%p1046_p1)
}
  0x25   :  { %s1175_s22 = smov 64   ;;  %s1176_s23 = smov 4  }
  0x26   :  { %62 = dma.hbm_to_vmem [thread:$0]  %s1308_s3, 4096, %s57_s12, [#allocation9], %s1175_s22, %s1175_s22, %s1176_s23  }
  0x27   :  { %s1050_s28 = scalar_lea.hbm %s1305_s0, 128 }
  0x28   :  { %p1051_p2 = scmp.ne.s32.totalorder %s1305_s0, %s1050_s28  ;;  %p1054_p3 = scmp.lt.u32.totalorder %s1050_s28, %s1305_s0 }
  0x2a   :  { %p1056_p4 = pnand %p1054_p3, %p1051_p2 }
  0x2c   :  { %1059 = shalt.err (!%p1056_p4)
}
  0x2d   :  { %s1060_s9 = scalar_lea.vmem %s23_s14, 128  ;;  %p1065_p6 = scmp.lt.s32.totalorder %s23_s14, %s23_s14 }
  0x2e   :  { %p1061_p5 = scmp.ne.s32.totalorder %s23_s14, %s1060_s9  ;;  %p1066_p7 = scmp.lt.s32.totalorder %s1060_s9, %s1060_s9 }
  0x30   :  { %p1067_p8 = por %p1066_p7, %p1065_p6 }
  0x32   :  { %p1068_p9 = pnand %p1067_p8, %p1061_p5 }
  0x34   :  { %1071 = shalt.err (!%p1068_p9)
}
  0x35   :  { %28 = dma.hbm_to_vmem [thread:$0]  %s1305_s0, 128, %s23_s14, [#allocation3], %s1175_s22, %s1175_s22, %s1176_s23  }
  0x36   :  { %s1177_s11 = smov [#allocation7]   ;;  %s1178_s13 = smov [#allocation10]  }
  0x37   :  { %s47_s12 = sshll.u32 %s1177_s11, 4  ;;  %s69_s15 = sshll.u32 %s1178_s13, 4  ;;  %s48_s12 = int_to_ptr.vmem [resolvable:$true] %s47_s12  ;;  %s70_s15 = int_to_ptr.vmem [resolvable:$true] %s69_s15 }
  0x38   :  { %s1072_s18 = scalar_lea.hbm %s1307_s2, 64 }
  0x39   :  { %p1073_p10 = scmp.ne.s32.totalorder %s1307_s2, %s1072_s18  ;;  %p1076_p11 = scmp.lt.u32.totalorder %s1072_s18, %s1307_s2 }
  0x3b   :  { %p1078_p12 = pnand %p1076_p11, %p1073_p10 }
  0x3d   :  { %1081 = shalt.err (!%p1078_p12)
}
  0x3e   :  { %s1082_s0 = scalar_lea.vmem %s48_s12, 64  ;;  %p1087_p0 = scmp.lt.s32.totalorder %s48_s12, %s48_s12 }
  0x3f   :  { %p1083_p13 = scmp.ne.s32.totalorder %s48_s12, %s1082_s0  ;;  %p1088_p1 = scmp.lt.s32.totalorder %s1082_s0, %s1082_s0 }
  0x41   :  { %p1089_p2 = por %p1088_p1, %p1087_p0 }
  0x43   :  { %p1090_p3 = pnand %p1089_p2, %p1083_p13 }
  0x45   :  { %1093 = shalt.err (!%p1090_p3)
}
  0x46   :  { %50 = dma.hbm_to_vmem [thread:$0]  %s1307_s2, 64, %s48_s12, [#allocation6]  }
  0x47   :  { %s1094_s25 = scalar_lea.hbm %s1309_s4, 16 }
  0x48   :  { %p1095_p4 = scmp.ne.s32.totalorder %s1309_s4, %s1094_s25  ;;  %p1098_p5 = scmp.lt.u32.totalorder %s1094_s25, %s1309_s4 }
  0x4a   :  { %p1100_p6 = pnand %p1098_p5, %p1095_p4 }
  0x4c   :  { %1103 = shalt.err (!%p1100_p6)
}
  0x4d   :  { %s1104_s30 = scalar_lea.vmem %s70_s15, 16  ;;  %s1108_s7 = scalar_lea.vmem %s70_s15, 32 }
  0x4e   :  { %p1105_p7 = scmp.ne.s32.totalorder %s70_s15, %s1104_s30  ;;  %p1109_p8 = scmp.lt.s32.totalorder %s70_s15, %s70_s15 }
  0x4f   :  { %p1110_p9 = scmp.lt.s32.totalorder %s1108_s7, %s1104_s30 }
  0x51   :  { %p1111_p10 = por %p1110_p9, %p1109_p8 }
  0x53   :  { %p1112_p11 = pnand %p1111_p10, %p1105_p7 }
  0x55   :  { %1115 = shalt.err (!%p1112_p11)
}
  0x56   :  { %72 = dma.hbm_to_vmem [thread:$0]  %s1309_s4, 16, %s70_s15, [#allocation9]  }
  0x57   :  { %1160 = dma.done.wait [#allocation3], 128  }
  0x58   :  { %1161 = vsyncadd [#allocation3], 4294967168 }
  0x59   :  { %1162 = dma.done.wait [#allocation6], 4160  }
  0x5a   :  { %1163 = vsyncadd [#allocation6], 4294963136 }
  0x5b   :  { %1164 = dma.done.wait [#allocation9], 4112  }
  0x5c   :  { %1165 = vsyncadd [#allocation9], 4294963184  ;;  %v1179_v0 = vmov 0   ;;  %v925_v1 = vld [vmem:[#allocation5 + $0x4] ss:$16 sps:$4 sm:$0xff]   ;;  %v973_v34 = vld [vmem:[#allocation2] sm:$0xff]  }
  0x5d   :  { %343 = vmatprep.mubr.bf16.mxu0 %v1179_v0  ;;  %386 = vmatprep.mubr.bf16.mxu1 %v1179_v0  ;;  %v927_v2 = vld [vmem:[#allocation5 + $0xc] ss:$16 sps:$4 sm:$0xff]   ;;  %v929_v3 = vld [vmem:[#allocation5] ss:$16 sps:$4 sm:$0xff]   ;;  %v930_v4 = vld [vmem:[#allocation5 + $0x8] ss:$16 sps:$4 sm:$0xff]  }
  0x5e   :  { %311 = vmatprep.subr.bf16.mxu0 %v925_v1  ;;  %354 = vmatprep.subr.bf16.mxu1 %v927_v2  ;;  %v931_v5 = vld [vmem:[#allocation5 + $0x24] ss:$16 sps:$4 sm:$0xff]   ;;  %v933_v6 = vld [vmem:[#allocation5 + $0x2c] ss:$16 sps:$4 sm:$0xff]   ;;  %v935_v7 = vld [vmem:[#allocation5 + $0x20] ss:$16 sps:$4 sm:$0xff]   ;;  %v125_v2 = vlaneseq }
  0x5f   :  { %312 = vmatpush1.bf16.msra.mxu0 %v929_v3  ;;  %355 = vmatpush1.bf16.msra.mxu1 %v930_v4  ;;  %v936_v8 = vld [vmem:[#allocation5 + $0x28] ss:$16 sps:$4 sm:$0xff]   ;;  %v937_v9 = vld [vmem:[#allocation5 + $0x44] ss:$16 sps:$4 sm:$0xff]   ;;  %v939_v10 = vld [vmem:[#allocation5 + $0x4c] ss:$16 sps:$4 sm:$0xff]  }
  0x60   :  { %313 = vmatprep.subr.bf16.mxu0 %v931_v5  ;;  %356 = vmatprep.subr.bf16.mxu1 %v933_v6  ;;  %v941_v11 = vld [vmem:[#allocation5 + $0x40] ss:$16 sps:$4 sm:$0xff]   ;;  %v942_v12 = vld [vmem:[#allocation5 + $0x48] ss:$16 sps:$4 sm:$0xff]   ;;  %v943_v13 = vld [vmem:[#allocation5 + $0x64] ss:$16 sps:$4 sm:$0xff]  }
  0x61   :  { %v945_v14 = vld [vmem:[#allocation5 + $0x6c] ss:$16 sps:$4 sm:$0xff]   ;;  %v947_v15 = vld [vmem:[#allocation5 + $0x60] ss:$16 sps:$4 sm:$0xff]   ;;  %v948_v16 = vld [vmem:[#allocation5 + $0x68] ss:$16 sps:$4 sm:$0xff]  }
  0x62   :  { %v949_v17 = vld [vmem:[#allocation5 + $0x84] ss:$16 sps:$4 sm:$0xff]   ;;  %v951_v18 = vld [vmem:[#allocation5 + $0x8c] ss:$16 sps:$4 sm:$0xff]   ;;  %v953_v19 = vld [vmem:[#allocation5 + $0x80] ss:$16 sps:$4 sm:$0xff]  }
  0x63   :  { %314 = vmatpush1.bf16.msra.mxu0 %v935_v7  ;;  %357 = vmatpush1.bf16.msra.mxu1 %v936_v8  ;;  %v954_v20 = vld [vmem:[#allocation5 + $0x88] ss:$16 sps:$4 sm:$0xff]   ;;  %v955_v21 = vld [vmem:[#allocation5 + $0xa4] ss:$16 sps:$4 sm:$0xff]   ;;  %v957_v22 = vld [vmem:[#allocation5 + $0xac] ss:$16 sps:$4 sm:$0xff]  }
  0x64   :  { %315 = vmatprep.subr.bf16.mxu0 %v937_v9  ;;  %358 = vmatprep.subr.bf16.mxu1 %v939_v10  ;;  %v959_v23 = vld [vmem:[#allocation5 + $0xa0] ss:$16 sps:$4 sm:$0xff]   ;;  %v960_v24 = vld [vmem:[#allocation5 + $0xa8] ss:$16 sps:$4 sm:$0xff]   ;;  %v961_v25 = vld [vmem:[#allocation5 + $0xc4] ss:$16 sps:$4 sm:$0xff]  }
  0x65   :  { %v963_v26 = vld [vmem:[#allocation5 + $0xcc] ss:$16 sps:$4 sm:$0xff]   ;;  %v965_v27 = vld [vmem:[#allocation5 + $0xc0] ss:$16 sps:$4 sm:$0xff]   ;;  %v966_v28 = vld [vmem:[#allocation5 + $0xc8] ss:$16 sps:$4 sm:$0xff]  }
  0x66   :  { %v967_v29 = vld [vmem:[#allocation5 + $0xe4] ss:$16 sps:$4 sm:$0xff]   ;;  %v969_v30 = vld [vmem:[#allocation5 + $0xec] ss:$16 sps:$4 sm:$0xff]   ;;  %v971_v31 = vld [vmem:[#allocation5 + $0xe0] ss:$16 sps:$4 sm:$0xff]  }
  0x67   :  { %316 = vmatpush1.bf16.msra.mxu0 %v941_v11  ;;  %359 = vmatpush1.bf16.msra.mxu1 %v942_v12  ;;  %v972_v32 = vld [vmem:[#allocation5 + $0xe8] ss:$16 sps:$4 sm:$0xff]   ;;  %v978_v38 = vld [vmem:[#allocation8 + $0x48] sm:$0xff]   ;;  %v986_v46 = vld [vmem:[#allocation8 + $0x58] sm:$0xff]   ;;  %v126_v3 = vshrl.u32 %v125_v2, 7  ;;  %s1180_s4 = smov [#allocation12]  }
  0x68   :  { %317 = vmatprep.subr.bf16.mxu0 %v943_v13  ;;  %360 = vmatprep.subr.bf16.mxu1 %v945_v14  ;;  %v974_v33 = vld [vmem:[#allocation8 + $0x40] sm:$0xff]   ;;  %v979_v39 = vld [vmem:[#allocation8 + $0xc8] sm:$0xff]   ;;  %v982_v42 = vld [vmem:[#allocation8 + $0x50] sm:$0xff]   ;;  %s781_s9 = sshll.u32 %s1180_s4, 4  ;;  %s782_s9 = int_to_ptr.vmem [resolvable:$true] %s781_s9 }
  0x69   :  { %v975_v35 = vld [vmem:[#allocation8 + $0xc0] sm:$0xff]   ;;  %v980_v40 = vld [vmem:[#allocation8 + $0x8] sm:$0xff]   ;;  %v983_v43 = vld [vmem:[#allocation8 + $0xd0] sm:$0xff]   ;;  %v127_v4 = vsub.s32 0, %v126_v3  ;;  %v135_v5 = vsub.s32 2, %v126_v3  ;;  %v131_v7 = vsub.s32 1, %v126_v3  ;;  %p1121_p13 = scmp.lt.s32.totalorder %s782_s9, %s782_s9 }
  0x6a   :  { %v976_v36 = vld [vmem:[#allocation8] sm:$0xff]   ;;  %v981_v41 = vld [vmem:[#allocation8 + $0x88] sm:$0xff]   ;;  %v984_v44 = vld [vmem:[#allocation8 + $0x10] sm:$0xff]   ;;  %v139_v8 = vsub.s32 3, %v126_v3  ;;  %s1116_s3 = scalar_lea.vmem %s782_s9, 1024 }
  0x6b   :  { %318 = vmatpush1.bf16.msra.mxu0 %v947_v15  ;;  %361 = vmatpush1.bf16.msra.mxu1 %v948_v16  ;;  %v977_v37 = vld [vmem:[#allocation8 + $0x80] sm:$0xff]   ;;  %v985_v45 = vld [vmem:[#allocation8 + $0x90] sm:$0xff]   ;;  %v987_v47 = vld [vmem:[#allocation8 + $0xd8] sm:$0xff]   ;;  %p1117_p12 = scmp.ne.s32.totalorder %s782_s9, %s1116_s3  ;;  %p1122_p0 = scmp.lt.s32.totalorder %s1116_s3, %s1116_s3 }
  0x6c   :  { %319 = vmatprep.subr.bf16.mxu0 %v949_v17  ;;  %362 = vmatprep.subr.bf16.mxu1 %v951_v18  ;;  %v988_v48 = vld [vmem:[#allocation8 + $0x18] sm:$0xff]   ;;  %v990_v50 = vld [vmem:[#allocation8 + $0x60] sm:$0xff]   ;;  %v994_v54 = vld [vmem:[#allocation8 + $0x68] sm:$0xff]  }
  0x6d   :  { %v989_v49 = vld [vmem:[#allocation8 + $0x98] sm:$0xff]   ;;  %v991_v51 = vld [vmem:[#allocation8 + $0xe0] sm:$0xff]   ;;  %v995_v55 = vld [vmem:[#allocation8 + $0xe8] sm:$0xff]   ;;  %p1123_p1 = por %p1122_p0, %p1121_p13 }
  0x6e   :  { %v992_v52 = vld [vmem:[#allocation8 + $0x20] sm:$0xff]   ;;  %v996_v56 = vld [vmem:[#allocation8 + $0x28] sm:$0xff]   ;;  %v998_v58 = vld [vmem:[#allocation8 + $0x70] sm:$0xff]  }
  0x6f   :  { %320 = vmatpush1.bf16.msra.mxu0 %v953_v19  ;;  %363 = vmatpush1.bf16.msra.mxu1 %v954_v20  ;;  %v993_v53 = vld [vmem:[#allocation8 + $0xa0] sm:$0xff]   ;;  %v997_v57 = vld [vmem:[#allocation8 + $0xa8] sm:$0xff]   ;;  %v999_v59 = vld [vmem:[#allocation8 + $0xf0] sm:$0xff]   ;;  %p1124_p2 = pnand %p1123_p1, %p1117_p12 }
  0x70   :  { %321 = vmatprep.subr.bf16.mxu0 %v955_v21  ;;  %364 = vmatprep.subr.bf16.mxu1 %v957_v22  ;;  %v1000_v60 = vld [vmem:[#allocation8 + $0x30] sm:$0xff]   ;;  %v1002_v62 = vld [vmem:[#allocation8 + $0x78] sm:$0xff]  }
  0x71   :  { %v1001_v61 = vld [vmem:[#allocation8 + $0xb0] sm:$0xff]   ;;  %v1003_v63 = vld [vmem:[#allocation8 + $0xf8] sm:$0xff]  }
  0x72   :  { %v1004_v0 = vld [vmem:[#allocation8 + $0x38] sm:$0xff]  }
  0x73   :  { %322 = vmatpush1.bf16.msra.mxu0 %v959_v23  ;;  %365 = vmatpush1.bf16.msra.mxu1 %v960_v24  ;;  %v1005_v1 = vld [vmem:[#allocation8 + $0xb8] sm:$0xff]  }
  0x74   :  { %323 = vmatprep.subr.bf16.mxu0 %v961_v25  ;;  %366 = vmatprep.subr.bf16.mxu1 %v963_v26  ;;  %v123_v6 = vld [vmem:[#allocation7] sm:$0xf] }
  0x75   :  { %v128_v9 = vrot.slane %v123_v6, %v127_v4  ;;  %v136_v10 = vrot.slane %v123_v6, %v135_v5  ;;  %v132_v11 = vrot.slane %v123_v6, %v131_v7  ;;  %v140_v12 = vrot.slane %v123_v6, %v139_v8 }
  0x77   :  { %324 = vmatpush1.bf16.msra.mxu0 %v965_v27  ;;  %367 = vmatpush1.bf16.msra.mxu1 %v966_v28 }
  0x78   :  { %325 = vmatprep.subr.bf16.mxu0 %v967_v29  ;;  %368 = vmatprep.subr.bf16.mxu1 %v969_v30 }
  0x7b   :  { %326 = vmatpush1.bf16.msra.mxu0 %v971_v31  ;;  %369 = vmatpush1.bf16.msra.mxu1 %v972_v32 }
  0x7c   :  { %865 = vmatprep.subr.bf16.mxu0 %v974_v33  ;;  %887 = vmatprep.subr.bf16.mxu1 %v975_v35 }
  0x7e   :  { %344 = vmatmul.mubr.bf16.vlgmr.msra.gmra.mrb[0].mxu0 %v973_v34  ;;  %387 = vmatmul.mubr.bf16.vlgmr.msra.gmra.mrb[0].mxu1 %v973_v34 }
  0x7f   :  { %866 = vmatpush3.bf16.msra.mxu0 %v976_v36  ;;  %888 = vmatpush3.bf16.msra.mxu1 %v977_v37 }
  0x80   :  { %867 = vmatprep.subr.bf16.mxu0 %v978_v38  ;;  %889 = vmatprep.subr.bf16.mxu1 %v979_v39 }
  0x83   :  { %868 = vmatpush3.bf16.msra.mxu0 %v980_v40  ;;  %890 = vmatpush3.bf16.msra.mxu1 %v981_v41 }
  0x84   :  { %869 = vmatprep.subr.bf16.mxu0 %v982_v42  ;;  %891 = vmatprep.subr.bf16.mxu1 %v983_v43 }
  0x87   :  { %870 = vmatpush3.bf16.msra.mxu0 %v984_v44  ;;  %892 = vmatpush3.bf16.msra.mxu1 %v985_v45 }
  0x88   :  { %871 = vmatprep.subr.bf16.mxu0 %v986_v46  ;;  %893 = vmatprep.subr.bf16.mxu1 %v987_v47 }
  0x8b   :  { %872 = vmatpush3.bf16.msra.mxu0 %v988_v48  ;;  %894 = vmatpush3.bf16.msra.mxu1 %v989_v49 }
  0x8c   :  { %873 = vmatprep.subr.bf16.mxu0 %v990_v50  ;;  %895 = vmatprep.subr.bf16.mxu1 %v991_v51 }
  0x8f   :  { %874 = vmatpush3.bf16.msra.mxu0 %v992_v52  ;;  %896 = vmatpush3.bf16.msra.mxu1 %v993_v53 }
  0x90   :  { %875 = vmatprep.subr.bf16.mxu0 %v994_v54  ;;  %897 = vmatprep.subr.bf16.mxu1 %v995_v55 }
  0x93   :  { %876 = vmatpush3.bf16.msra.mxu0 %v996_v56  ;;  %898 = vmatpush3.bf16.msra.mxu1 %v997_v57 }
  0x94   :  { %877 = vmatprep.subr.bf16.mxu0 %v998_v58  ;;  %899 = vmatprep.subr.bf16.mxu1 %v999_v59 }
  0x97   :  { %878 = vmatpush3.bf16.msra.mxu0 %v1000_v60  ;;  %900 = vmatpush3.bf16.msra.mxu1 %v1001_v61 }
  0x98   :  { %879 = vmatprep.subr.bf16.mxu0 %v1002_v62  ;;  %901 = vmatprep.subr.bf16.mxu1 %v1003_v63 }
  0x9b   :  { %880 = vmatpush3.bf16.msra.mxu0 %v1004_v0  ;;  %902 = vmatpush3.bf16.msra.mxu1 %v1005_v1 }
 0x151   :  { %v345_v13 = vpop.f32.mrb[0].mxu0  ;;  %v388_v14 = vpop.f32.mrb[0].mxu1 }
 0x152   :  { %v346_v15 = vadd.f32 %v345_v13, %v128_v9  ;;  %v389_v16 = vadd.f32 %v388_v14, %v136_v10  ;;  %v347_v17 = vpop.f32.mrb[1].mxu0  ;;  %v390_v18 = vpop.f32.mrb[1].mxu1 }
 0x153   :  { %v348_v19 = vadd.f32 %v347_v17, %v132_v11  ;;  %v391_v20 = vadd.f32 %v390_v18, %v140_v12  ;;  %v349_v21 = vpop.f32.mrb[2].mxu0  ;;  %v392_v22 = vpop.f32.mrb[2].mxu1 }
 0x154   :  { %v397_v23 = vmax.f32 %v346_v15, 0.0  ;;  %v399_v24 = vmax.f32 %v389_v16, 0.0  ;;  %v350_v25 = vadd.f32 %v349_v21, %v128_v9  ;;  %v393_v26 = vadd.f32 %v392_v22, %v136_v10  ;;  %v351_v27 = vpop.f32.mrb[3].mxu0  ;;  %v394_v28 = vpop.f32.mrb[3].mxu1 }
 0x155   :  { %v398_v29 = vmax.f32 %v348_v19, 0.0  ;;  %v400_v30 = vmax.f32 %v391_v20, 0.0  ;;  %v352_v31 = vadd.f32 %v351_v27, %v132_v11  ;;  %v395_v32 = vadd.f32 %v394_v28, %v140_v12 }
 0x156   :  { %405 = vst [vmem:[#allocation12] sm:$0xff] %v397_v23  ;;  %407 = vst [vmem:[#allocation12 + $0x10] sm:$0xff] %v399_v24  ;;  %v401_v33 = vmax.f32 %v350_v25, 0.0  ;;  %v403_v34 = vmax.f32 %v393_v26, 0.0 }
 0x157   :  { %406 = vst [vmem:[#allocation12 + $0x8] sm:$0xff] %v398_v29  ;;  %408 = vst [vmem:[#allocation12 + $0x18] sm:$0xff] %v400_v30  ;;  %v402_v35 = vmax.f32 %v352_v31, 0.0  ;;  %v404_v36 = vmax.f32 %v395_v32, 0.0 }
 0x158   :  { %409 = vst [vmem:[#allocation12 + $0x20] sm:$0xff] %v401_v33  ;;  %v413_v37 = vpack.c.bf16 %v401_v33, %v397_v23  ;;  %411 = vst [vmem:[#allocation12 + $0x30] sm:$0xff] %v403_v34  ;;  %v415_v38 = vpack.c.bf16 %v403_v34, %v399_v24 }
 0x159   :  { %410 = vst [vmem:[#allocation12 + $0x28] sm:$0xff] %v402_v35  ;;  %v414_v39 = vpack.c.bf16 %v402_v35, %v398_v29  ;;  %412 = vst [vmem:[#allocation12 + $0x38] sm:$0xff] %v404_v36  ;;  %v416_v40 = vpack.c.bf16 %v404_v36, %v400_v30 }
 0x15b   :  { %712 = vmatprep.mubr.bf16.mxu0 %v414_v39  ;;  %753 = vmatprep.mubr.bf16.mxu1 %v416_v40 }
 0x15c   :  { %713 = vmatmul.mubr.bf16.vlgmr.msra.gmra.mrb[4].mxu0 %v413_v37  ;;  %754 = vmatmul.mubr.bf16.vlgmr.msra.gmra.mrb[4].mxu1 %v415_v38 }
 0x15d   :  { %1127 = shalt.err (!%p1124_p2)
}
 0x15e   :  { %s1128_s12 = scalar_lea.hbm %s1311_s6, 1024 }
 0x15f   :  { %p1129_p3 = scmp.ne.s32.totalorder %s1311_s6, %s1128_s12  ;;  %p1132_p4 = scmp.lt.u32.totalorder %s1128_s12, %s1311_s6 }
 0x161   :  { %p1134_p5 = pnand %p1132_p4, %p1129_p3 }
 0x163   :  { %1137 = shalt.err (!%p1134_p5)
}
 0x164   :  { %s1181_s18 = smov 512   ;;  %s1182_s19 = smov 32   ;;  %v832_v43 = vld [vmem:[#allocation10] ss:$0 sm:$0xff] }
 0x165   :  { %787 = dma.vmem_to_hbm [thread:$0]  %s782_s9, 1024, %s1311_s6, [#allocation13], %s1181_s18, %s1181_s18, %s1182_s19  }
 0x166   :  { %s1183_s1 = smov [#allocation11]  }
 0x167   :  { %s769_s0 = sshll.u32 %s1183_s1, 4  ;;  %s770_s0 = int_to_ptr.vmem [resolvable:$true] %s769_s0 }
 0x168   :  { %s1138_s6 = scalar_lea.vmem %s770_s0, 256  ;;  %p1143_p7 = scmp.lt.s32.totalorder %s770_s0, %s770_s0 }
 0x169   :  { %p1139_p6 = scmp.ne.s32.totalorder %s770_s0, %s1138_s6  ;;  %p1144_p8 = scmp.lt.s32.totalorder %s1138_s6, %s1138_s6 }
 0x16b   :  { %p1145_p9 = por %p1144_p8, %p1143_p7 }
 0x16d   :  { %p1146_p10 = pnand %p1145_p9, %p1139_p6 }
 0x22f   :  { %v881_v41 = vpop.f32.mrb[4].mxu0  ;;  %v903_v42 = vpop.f32.mrb[4].mxu1 }
 0x230   :  { %v882_v44 = vpop.f32.mrb[5].mxu0  ;;  %v904_v45 = vpop.f32.mrb[5].mxu1 }
 0x231   :  { %v883_v46 = vadd.f32 %v882_v44, %v881_v41  ;;  %v905_v47 = vadd.f32 %v904_v45, %v903_v42  ;;  %v884_v48 = vpop.f32.mrb[6].mxu0  ;;  %v906_v49 = vpop.f32.mrb[6].mxu1 }
 0x232   :  { %v885_v50 = vpop.f32.mrb[7].mxu0  ;;  %v907_v51 = vpop.f32.mrb[7].mxu1 }
 0x233   :  { %v715_v52 = vadd.f32 %v883_v46, %v832_v43  ;;  %v886_v53 = vadd.f32 %v885_v50, %v884_v48  ;;  %v908_v54 = vadd.f32 %v907_v51, %v906_v49 }
 0x235   :  { %v756_v55 = vadd.f32 %v905_v47, %v715_v52  ;;  %v718_v56 = vadd.f32 %v886_v53, %v832_v43 }
 0x237   :  { %762 = vst [vmem:[#allocation11] sm:$0xff] %v756_v55  ;;  %v759_v57 = vadd.f32 %v908_v54, %v718_v56 }
 0x239   :  { %763 = vst [vmem:[#allocation11 + $0x8] sm:$0xff] %v759_v57 }
 0x23a   :  { %1149 = shalt.err (!%p1146_p10)
}
 0x23b   :  { %s1150_s23 = scalar_lea.hbm %s1310_s5, 256 }
 0x23c   :  { %p1151_p11 = scmp.ne.s32.totalorder %s1310_s5, %s1150_s23  ;;  %p1154_p12 = scmp.lt.u32.totalorder %s1150_s23, %s1310_s5 }
 0x23e   :  { %p1156_p13 = pnand %p1154_p12, %p1151_p11 }
 0x240   :  { %1159 = shalt.err (!%p1156_p13)
}
 0x241   :  { %s1184_s28 = smov 128   ;;  %s1185_s29 = smov 8  }
 0x242   :  { %775 = dma.vmem_to_hbm [thread:$0]  %s770_s0, 256, %s1310_s5, [#allocation4], %s1184_s28, %s1184_s28, %s1185_s29  }
 0x243   :  { %1166 = dma.done.wait [#allocation4], 256  }
 0x244   :  { %1167 = vsyncadd [#allocation4], 4294967040 }
 0x245   :  { %1168 = dma.done.wait [#allocation13], 1024  }
 0x246   :  { %1169 = vsyncadd [#allocation13], 4294966272 }
 0x247   :  { %794 = vsyncpa [#allocation3], 1 }
 0x248   :  { %795 = vsyncpa [#allocation6], 1 }
 0x249   :  { %796 = vsyncpa [#allocation9], 1 }
 0x24a   :  { %797 = vsyncpa [#allocation4], 1 }
 0x24b   :  { %798 = vsyncpa [#allocation13], 1 }

</bundles_post_ra>
